<compile_context>
chip_gen: v5e
topology: v5e:2x2
jax: 0.10.0
libtpu: 0.0.40
codegen_flags: <defaults>
</compile_context>

<pallas_src>
import functools

import jax
import jax.numpy as jnp
from jax.experimental import pallas as pl
from jax.experimental.pallas import tpu as pltpu

_SUBLANE = 8            # f32 sublane tile
_LANE = 128             # lane tile
_SLAB_LANES = 1024      # preferred lane-dense slab width (multiple of 128)
_MIN_SPLIT_BYTES = 1 << 20   # only force >=2 grid steps above this size


@functools.lru_cache(maxsize=None)
def _chip_config():
    """Per-generation tuning: (block_bytes, vmem_limit_bytes|None, bf16_ok)."""
    kind = ""
    try:
        kind = jax.devices()[0].device_kind.lower()
    except Exception:
        pass
    if "v5" in kind:
        # v5e: 16 MiB default scoped VMEM, no bf16 VPU -> small blocks, f32.
        return 2 * 1024 * 1024, None, False
    if "v6" in kind:
        # v6e: 32 MiB scoped VMEM; 4 double-buffered 4 MiB buffers fit.
        return 4 * 1024 * 1024, None, True
    if "v7" in kind:
        # v7x: 3.2 TB/s HBM -> bigger blocks; raise scoped VMEM explicitly
        # but stay well under the 64 MiB physical VMEM.
        return 4 * 1024 * 1024, 48 * 1024 * 1024, True
    return 2 * 1024 * 1024, None, True


# ----------------------------------------------------------------------------
# Pallas kernel: fused elementwise chain with scalar broadcast
# ----------------------------------------------------------------------------
def _chain_kernel(op_list, compute_dtype, s_ref, x_ref, o_ref):
    """Apply a static chain of elementwise ops to one tile in a single pass.

    op_list: static tuple of (op_name, scalar_index | None), unrolled at
             trace time.
    s_ref:   (1, n_scalars) float32 scalar parameters in SMEM (broadcast).
    """
    y = x_ref[...].astype(compute_dtype)
    for op_name, s_idx in op_list:
        if op_name == "prod":
            y = y * s_ref[0, s_idx].astype(compute_dtype)
        elif op_name == "add":
            y = y + s_ref[0, s_idx].astype(compute_dtype)
        elif op_name == "relu":
            # scalar constant 0: no full-tile zeros materialized
            y = jnp.maximum(y, 0.0)
        else:
            raise NotImplementedError(op_name)
    o_ref[...] = y.astype(o_ref.dtype)


def _fused_elementwise(x, op_list, scalars):
    """Run a fused chain of scalar-broadcast elementwise ops over `x`."""
    return _fused_elementwise_impl(x, tuple(op_list), *scalars)


@functools.partial(jax.jit, static_argnums=(1,))
def _fused_elementwise_impl(x, op_list, *scalars):
    orig_shape = x.shape
    dtype = x.dtype
    itemsize = jnp.dtype(dtype).itemsize
    total = int(x.size)
    target_bytes, vmem_limit, bf16_ok = _chip_config()

    if total == 0:
        return jnp.reshape(x, orig_shape)

    # ---- pick a pad-free 2-D view ------------------------------------------
    if total % _LANE == 0:
        # Re-layout: flatten & view as a lane-dense slab -> unmasked
        # full-lane stores, no HBM-traffic inflation for small last dims.
        cols = _LANE
        for cand in range(min(_SLAB_LANES, total), _LANE - 1, -_LANE):
            if total % cand == 0:
                cols = cand
                break
        rows = total // cols
        x2 = jnp.reshape(x, (rows, cols))
    else:
        # Ragged fallback: run directly on the logical (r, c) view.  Block
        # dims are (8,128)-multiples or equal the full dim; Pallas masks the
        # partial trailing blocks (safe: chain is purely elementwise).
        if x.ndim <= 1:
            x2 = jnp.reshape(x, (1, total))
        else:
            x2 = jnp.reshape(x, (-1, orig_shape[-1]))
        rows, cols = x2.shape

    cols_pad = pl.cdiv(cols, _LANE) * _LANE       # VMEM layout width

    # ---- block shape: fill ~target_bytes, lane-split only if rows are huge -
    lane_budget = max(
        _LANE, (target_bytes // (_SUBLANE * itemsize)) // _LANE * _LANE)
    if cols_pad <= lane_budget:
        bc, bc_pad = cols, cols_pad               # full lane extent
    else:
        bc = bc_pad = lane_budget                 # lane-axis grid dimension

    rows8 = pl.cdiv(rows, _SUBLANE) * _SUBLANE
    rows_fit = max(
        _SUBLANE,
        (target_bytes // max(1, bc_pad * itemsize)) // _SUBLANE * _SUBLANE)
    br = min(rows_fit, rows8)
    if br >= rows:
        br = rows                                 # full dim (covers rows < 8)

    grid_r, grid_c = pl.cdiv(rows, br), pl.cdiv(cols, bc)
    # Megacore guard: large single-block tensors get >=2 grid steps so
    # v7x's two TensorCores ("parallel" axes) and the pipeline have work.
    # Size-gated so tiny tensors don't pay extra step overhead on 1-TC chips.
    if (grid_r * grid_c == 1 and rows > _SUBLANE
            and total * itemsize >= _MIN_SPLIT_BYTES):
        br = max(_SUBLANE, pl.cdiv(pl.cdiv(rows, 2), _SUBLANE) * _SUBLANE)
        grid_r = pl.cdiv(rows, br)

    # ---- scalar parameters -> SMEM (built once per trace) -------------------
    if scalars:
        s = jnp.concatenate(
            [jnp.reshape(v, (1,)).astype(jnp.float32) for v in scalars]
        ).reshape(1, len(scalars))
    else:
        s = jnp.zeros((1, 1), jnp.float32)        # dummy (unused)
    n_s = s.shape[1]

    compute_dtype = (jnp.bfloat16
                     if (dtype == jnp.bfloat16 and bf16_ok) else jnp.float32)

    cp_kwargs = dict(dimension_semantics=("parallel", "parallel"))
    if vmem_limit is not None:
        cp_kwargs["vmem_limit_bytes"] = vmem_limit

    out = pl.pallas_call(
        functools.partial(_chain_kernel, op_list, compute_dtype),
        out_shape=jax.ShapeDtypeStruct((rows, cols), dtype),
        grid=(grid_r, grid_c),
        in_specs=[
            # Tiny scalar vector lives in SMEM; constant index map => no
            # per-step re-fetch.
            pl.BlockSpec((1, n_s), lambda i, j: (0, 0),
                         memory_space=pltpu.MemorySpace.SMEM),
            pl.BlockSpec((br, bc), lambda i, j: (i, j)),
        ],
        out_specs=pl.BlockSpec((br, bc), lambda i, j: (i, j)),
        compiler_params=pltpu.CompilerParams(**cp_kwargs),
    )(s, x2)

    return jnp.reshape(out, orig_shape)


# ----------------------------------------------------------------------------
# Op registry (unfused fallback path; each op = one 1-step fused call)
# ----------------------------------------------------------------------------
def _split_tensor_scalar(inputs):
    a, b = inputs
    if b.ndim <= 1 and b.size == 1:
        return a, b
    if a.ndim <= 1 and a.size == 1:
        return b, a
    return None


def _op_prod(inputs):
    split = _split_tensor_scalar(inputs)
    if split is None:
        return inputs[0] * inputs[1]   # tensor-tensor: not on the hot path
    x, s = split
    return _fused_elementwise(x, (("prod", 0),), [s])


def _op_add(inputs):
    split = _split_tensor_scalar(inputs)
    if split is None:
        return inputs[0] + inputs[1]
    x, s = split
    return _fused_elementwise(x, (("add", 0),), [s])


def _op_relu(inputs):
    (x,) = inputs
    return _fused_elementwise(x, (("relu", None),), [])


_OPS = {"prod": _op_prod, "add": _op_add, "relu": _op_relu}
_FUSIBLE_OPS = frozenset(_OPS)


# ----------------------------------------------------------------------------
# Node types (mirroring nodes_.*)
# ----------------------------------------------------------------------------
class Node:
    name = "node"


class DataNode(Node):
    name = "data"


class InputNode(DataNode):
    name = "input"


class OutputNode(DataNode):
    name = "output"


class ResponseInputNode(DataNode):
    name = "response_input"


class LossOutputNode(DataNode):
    name = "loss_output"


class ParameterNode(DataNode):
    name = "parameter"


class OperatorNode(Node):
    def __init__(self, op_name):
        self.op_name = op_name
        self.name = op_name

    def get_op(self):
        return _OPS[self.op_name]


def topsort_edge_list(num_nodes, edge_list):
    """Kahn's algorithm over an (from, to) edge list."""
    adj = [[] for _ in range(num_nodes)]
    indeg = [0] * num_nodes
    for frm, to in edge_list:
        adj[frm].append(to)
        indeg[to] += 1
    stack = [i for i in range(num_nodes) if indeg[i] == 0]
    order = []
    while stack:
        n = stack.pop()
        order.append(n)
        for m in adj[n]:
            indeg[m] -= 1
            if indeg[m] == 0:
                stack.append(m)
    assert len(order) == num_nodes, "graph has a cycle"
    return order


# ----------------------------------------------------------------------------
# CompiledGraph: JAX port of the PyTorch executor (+ elementwise chain fusion)
# ----------------------------------------------------------------------------
class CompiledGraph:
    def __init__(self, nodes, rev_adjacency_list, param_key):
        edge_list = []
        for to_idx, from_indices in enumerate(rev_adjacency_list):
            for from_idx in from_indices:
                edge_list.append((from_idx, to_idx))
        topsorted = topsort_edge_list(len(nodes), edge_list)
        topsorted_idx = {node_id: i for i, node_id in enumerate(topsorted)}
        self.nodes = [nodes[i] for i in topsorted]

        sorted_rev_adj = [[] for _ in range(len(nodes))]
        for to_idx, from_indices in enumerate(rev_adjacency_list):
            sorted_rev_adj[topsorted_idx[to_idx]] = [
                topsorted_idx[f] for f in from_indices]
        self.rev_adjacency_list = sorted_rev_adj

        self.stored_modules = {}
        self.stored_parameters = {}
        self.input_nodes = []
        self.output_nodes = []
        self.response_input_nodes = []
        self.loss_output_node = None
        for node_id, node in enumerate(self.nodes):
            if isinstance(node, OperatorNode):
                self.stored_modules[str(node_id)] = node.get_op()
            if isinstance(node, ParameterNode):
                self.stored_parameters[str(node_id)] = jnp.zeros((1,),
                                                                 jnp.float32)
            if isinstance(node, InputNode):
                self.input_nodes.append(node_id)
            if isinstance(node, OutputNode):
                self.output_nodes.append(node_id)
            if isinstance(node, ResponseInputNode):
                self.response_input_nodes.append(node_id)
            if isinstance(node, LossOutputNode):
                self.loss_output_node = node_id

        self._param_node_ids = sorted(int(k) for k in self.stored_parameters)
        self._plan_fusion()
        self.reset_parameters(param_key)
        self.nuke_data()
        # Whole-forward jit: removes per-node eager dispatch / launch latency
        # and lets XLA fold the reshapes around each fused Pallas call.
        self._jit_forward = jax.jit(self._forward_impl)

    # -- elementwise chain fusion pass ---------------------------------------
    def _plan_fusion(self):
        """Collapse consecutive single-consumer elementwise OperatorNodes into
        fused chains executed by one Pallas kernel at the chain tail."""
        n = len(self.nodes)
        consumers = [[] for _ in range(n)]
        for to_idx, froms in enumerate(self.rev_adjacency_list):
            for f in froms:
                consumers[f].append(to_idx)

        def split_inputs(node_id):
            node = self.nodes[node_id]
            ins = self.rev_adjacency_list[node_id]
            if node.op_name == "relu":
                if len(ins) != 1:
                    return None
                return ins[0], None
            if len(ins) != 2:
                return None
            a, b = ins
            a_param = isinstance(self.nodes[a], ParameterNode)
            b_param = isinstance(self.nodes[b], ParameterNode)
            if a_param == b_param:
                return None  # need exactly one scalar-parameter input
            return (b, a) if a_param else (a, b)

        is_fusible = [False] * n
        info = [None] * n
        for nid, node in enumerate(self.nodes):
            if isinstance(node, OperatorNode) and node.op_name in _FUSIBLE_OPS:
                s = split_inputs(nid)
                if s is not None:
                    is_fusible[nid] = True
                    info[nid] = s

        self.fused_members = set()   # nodes subsumed by a chain (skip)
        self.fused_chains = {}       # tail node id -> (src node id, steps)
        visited = set()
        for nid in range(n):          # topsorted order
            if not is_fusible[nid] or nid in visited:
                continue
            src = info[nid][0]
            if is_fusible[src] and len(consumers[src]) == 1:
                continue              # absorbed into its predecessor's chain
            chain = [nid]
            cur = nid
            while True:
                cons = consumers[cur]
                if len(cons) != 1:
                    break
                nxt = cons[0]
                if not is_fusible[nxt] or info[nxt][0] != cur:
                    break
                chain.append(nxt)
                cur = nxt
            steps = tuple((self.nodes[c].op_name, info[c][1]) for c in chain)
            visited.update(chain)
            self.fused_chains[chain[-1]] = (info[chain[0]][0], steps)
            self.fused_members.update(chain[:-1])

    # -- parameters / data ----------------------------------------------------
    def reset_parameters(self, key):
        # nn.init.normal_ on each (1,) parameter, deterministic under `key`.
        for node_id in self._param_node_ids:
            key, sub = jax.random.split(key)
            self.stored_parameters[str(node_id)] = jax.random.normal(
                sub, (1,), jnp.float32)

    def nuke_data(self):
        self.curr_data = None

    def init_data(self):
        self.curr_data = [None for _ in range(len(self.nodes))]

    # -- execution ------------------------------------------------------------
    def _forward_impl(self, inputs, params):
        data = [None for _ in range(len(self.nodes))]
        for node_id, inp in zip(self.input_nodes, inputs):
            data[node_id] = inp
        for node_id, p in zip(self._param_node_ids, params):
            data[node_id] = p
        for node_id, node in enumerate(self.nodes):
            if isinstance(node, (ResponseInputNode, LossOutputNode)):
                continue
            self.infer_node(node_id, data)
        outputs = []
        for node_id in self.output_nodes:
            assert data[node_id] is not None, \
                f"Output node {node_id} has not been inferred."
            outputs.append(data[node_id])
        return outputs, data

    def forward(self, inputs):
        self.init_data()
        params = tuple(self.stored_parameters[str(nid)]
                       for nid in self._param_node_ids)
        outputs, data = self._jit_forward(tuple(inputs), params)
        self.curr_data = list(data)
        return list(outputs)

    def _infer_fused(self, tail_id, data):
        src_id, steps = self.fused_chains[tail_id]
        x = data[src_id]
        if x is None:
            return
        op_list, scalars = [], []
        for op_name, pid in steps:
            if pid is None:
                op_list.append((op_name, None))
            else:
                p = data[pid]
                if p is None:
                    return
                op_list.append((op_name, len(scalars)))
                scalars.append(p)
        data[tail_id] = _fused_elementwise(x, tuple(op_list), scalars)

    def infer_node(self, node_id, data=None):
        if data is None:
            assert self.curr_data is not None
            data = self.curr_data
        if data[node_id] is not None:
            return
        if node_id in self.fused_members:
            return  # computed (fused) at the chain tail; no external consumers
        if node_id in self.fused_chains:
            self._infer_fused(node_id, data)
            return
        node = self.nodes[node_id]
        if isinstance(node, DataNode):
            input_node_ids = self.rev_adjacency_list[node_id]
            assert len(input_node_ids) == 1, \
                "Output nodes should only have one incoming edge."
            inp = data[input_node_ids[0]]
            if inp is not None:
                data[node_id] = inp
            return
        if isinstance(node, OperatorNode):
            input_data = []
            for i in self.rev_adjacency_list[node_id]:
                inp_data = data[i]
                if inp_data is None:
                    return
                input_data.append(inp_data)
            op = self.stored_modules[str(node_id)]
            data[node_id] = op(input_data)

    def response_forward(self, inputs):
        assert self.curr_data is not None, "Data has not been initialized."
        for node_id, inp in zip(self.response_input_nodes, inputs):
            self.curr_data[node_id] = inp
        for node_id in range(len(self.nodes)):
            self.infer_node(node_id)
        output = self.curr_data[self.loss_output_node]
        assert output is not None, "Loss output node has not been inferred."
        self.nuke_data()
        return output

    # TODO(synk): show_compiled (Graphviz rendering) and from_graph (external
    # graph_ module) are host-side utilities with no Pallas equivalent.


# ----------------------------------------------------------------------------
# Pure-JAX reference executor (same graph semantics, no Pallas) for checking
# ----------------------------------------------------------------------------
def reference_forward(graph, inputs):
    data = [None] * len(graph.nodes)
    for nid, inp in zip(graph.input_nodes, inputs):
        data[nid] = inp
    for k, p in graph.stored_parameters.items():
        data[int(k)] = p
    for nid, node in enumerate(graph.nodes):
        if isinstance(node, (ResponseInputNode, LossOutputNode)):
            continue
        if data[nid] is not None:
            continue
        ins = [data[i] for i in graph.rev_adjacency_list[nid]]
        if isinstance(node, OperatorNode):
            if node.op_name == "prod":
                val = ins[0]
                for v in ins[1:]:
                    val = val * v
            elif node.op_name == "add":
                val = ins[0]
                for v in ins[1:]:
                    val = val + v
            elif node.op_name == "relu":
                val = jnp.maximum(ins[0], 0.0)
            else:
                raise NotImplementedError(node.op_name)
            data[nid] = val
        elif isinstance(node, DataNode):
            data[nid] = ins[0]
    return [data[nid] for nid in graph.output_nodes]


# ----------------------------------------------------------------------------
# Build a concrete graph instance:  out = relu(x * p + q)
# ----------------------------------------------------------------------------
def build_example_graph():
    nodes = [
        InputNode(),            # 0: x
        ParameterNode(),        # 1: p  (shape (1,))
        OperatorNode("prod"),   # 2: x * p
        ParameterNode(),        # 3: q  (shape (1,))
        OperatorNode("add"),    # 4: (x*p) + q
        OperatorNode("relu"),   # 5: relu(...)
        OutputNode(),           # 6: output
    ]
    rev_adj = [[], [], [0, 1], [], [2, 3], [4], [5]]
    return CompiledGraph(nodes, rev_adj, param_key=jax.random.PRNGKey(0))


if __name__ == "__main__":
    graph = build_example_graph()

    # 4-D input (batch=2, channels=4, spatial=16x16): lane-dense slab path
    # (flattened to a (rows, 1024) view; unmasked full-lane stores).
    x = jax.random.normal(jax.random.PRNGKey(0), (2, 4, 16, 16), jnp.float32)
    out = jax.block_until_ready(graph.forward([x])[0])
    expected = reference_forward(graph, [x])[0]
    assert out.shape == x.shape and out.dtype == x.dtype
    assert jnp.allclose(out, expected, atol=1e-6, rtol=1e-6), \
        "mismatch vs reference (4-D slab path)"

    # Tiny trailing dim: previously lane-padded 8 -> 128 (16x traffic); now a
    # lane-dense slab with zero padding.
    x2 = jax.random.normal(jax.random.PRNGKey(1), (64, 8), jnp.float32)
    out2 = jax.block_until_ready(graph.forward([x2])[0])
    expected2 = reference_forward(graph, [x2])[0]
    assert jnp.allclose(out2, expected2, atol=1e-6, rtol=1e-6), \
        "mismatch vs reference (small last dim)"

    # Non-(8,128)-aligned shape exercises the pad-free ragged-block path.
    x3 = jax.random.normal(jax.random.PRNGKey(2), (10, 200), jnp.float32)
    out3 = jax.block_until_ready(graph.forward([x3])[0])
    expected3 = reference_forward(graph, [x3])[0]
    assert jnp.allclose(out3, expected3, atol=1e-6, rtol=1e-6), \
        "mismatch vs reference (unaligned)"

    print("KERNEL_OK")
</pallas_src>

<mosaic_0001>
module attributes {stable_mosaic.version = 11 : i64} {
  func.func @_chain_kernel(%arg0: i32, %arg1: i32, %arg2: memref<1x2xf32, #tpu.memory_space<smem>>, %arg3: memref<2x1024xf32, #tpu.memory_space<vmem>>, %arg4: memref<2x1024xf32, #tpu.memory_space<vmem>>) attributes {dimension_semantics = [#tpu.dimension_semantics<parallel>, #tpu.dimension_semantics<parallel>], iteration_bounds = array<i64: 1, 1>, scalar_prefetch = 0 : i64, scratch_operands = 0 : i64, tpu.core_type = #tpu.core_type<tc>, window_params = [{transform_indices = @transform_0, window_bounds = array<i64: 1, 2>}, {transform_indices = @transform_1, window_bounds = array<i64: 2, 1024>}, {transform_indices = @transform_2, window_bounds = array<i64: 2, 1024>}]} {
    %c0 = arith.constant 0 : index
    %c0_0 = arith.constant 0 : index
    %0 = vector.load %arg3[%c0, %c0_0] : memref<2x1024xf32, #tpu.memory_space<vmem>>, vector<2x1024xf32>
    %c0_1 = arith.constant 0 : index
    %c0_2 = arith.constant 0 : index
    %1 = memref.load %arg2[%c0_1, %c0_2] : memref<1x2xf32, #tpu.memory_space<smem>>
    %2 = vector.broadcast %1 : f32 to vector<2x1024xf32>
    %3 = arith.mulf %0, %2 : vector<2x1024xf32>
    %c0_3 = arith.constant 0 : index
    %c1 = arith.constant 1 : index
    %4 = memref.load %arg2[%c0_3, %c1] : memref<1x2xf32, #tpu.memory_space<smem>>
    %5 = vector.broadcast %4 : f32 to vector<2x1024xf32>
    %6 = arith.addf %3, %5 : vector<2x1024xf32>
    %cst = arith.constant 0.000000e+00 : f32
    %7 = vector.broadcast %cst : f32 to vector<2x1024xf32>
    %8 = arith.maximumf %6, %7 : vector<2x1024xf32>
    %c0_4 = arith.constant 0 : index
    %c0_5 = arith.constant 0 : index
    %9 = vector.load %arg4[%c0_4, %c0_5] : memref<2x1024xf32, #tpu.memory_space<vmem>>, vector<2x1024xf32>
    tpu.vector_store %arg4[%c0_4, %c0_5], %8 {strides = array<i32>} : memref<2x1024xf32, #tpu.memory_space<vmem>>, vector<2x1024xf32>,
    return
  }
  func.func @transform_0(%arg0: i32, %arg1: i32) -> (i32, i32) {
    %c0_i32 = arith.constant 0 : i32
    %c0_i32_0 = arith.constant 0 : i32
    %c0_i32_1 = arith.constant 0 : i32
    return %c0_i32, %c0_i32_0 : i32, i32
  }
  func.func @transform_1(%arg0: i32, %arg1: i32) -> (i32, i32) {
    %c0_i32 = arith.constant 0 : i32
    return %arg0, %arg1 : i32, i32
  }
  func.func @transform_2(%arg0: i32, %arg1: i32) -> (i32, i32) {
    %c0_i32 = arith.constant 0 : i32
    return %arg0, %arg1 : i32, i32
  }
}

</mosaic_0001>

<bundles_post_ra>
// kernel: _fused_elementwise_impl.1
= control target key start
LH: loop header
LB: loop body
LE: loop exit
PB: predicated region body
PF: predicated region fallthrough
CT: control target
= control target key end

     0   :  { %7 = vsyncpa [#allocation3], 0  ;;  %s59_s12 = smov [#allocation2]   ;;  %s90_s0 = inlined_call_operand.vmem [shape: f32[1,2], index: 0, kind: input, shape index: {}]   ;;  %s91_s1 = inlined_call_operand.vmem [shape: f32[2,1024], index: 1, kind: input, shape index: {}]   ;;  %s92_s2 = inlined_call_operand.vmem [shape: f32[2,1024], index: 2, kind: output, shape index: {}]  }
   0x1   :  { %s13_s11 = sshll.u32 %s90_s0, 4  ;;  %s14_s11 = int_to_ptr.vmem [resolvable:$true] %s13_s11 }
   0x2   :  { %16 = dma.vmem_to_smem %s14_s11, 16, %s59_s12, [#allocation3]  }
   0x3   :  { %57 = dma.done.wait [#allocation3], 16  }
   0x4   :  { %58 = vsyncadd [#allocation3], 4294967280 }
   0x5   :  { %23 = sfence }
   0x6   :  { %s26_s13 = sld [smem:[#allocation2]]  ;;  %v24_v0 = vld [vmem:[%s91_s1] sm:$0xff]  ;;  %v25_v1 = vld [vmem:[%s91_s1 + $0x8] sm:$0xff] }
   0x7   :  { %s43_s14 = sld [smem:[#allocation2 + $0x1]] }
   0xc   :  { %v27_v2 = vstv %s26_s13 }
   0xd   :  { %v28_v3 = vmul.f32 %v27_v2, %v24_v0  ;;  %v31_v4 = vstv %s43_s14  ;;  %v29_v5 = vmul.f32 %v27_v2, %v25_v1 }
   0xf   :  { %v32_v6 = vadd.f32 %v31_v4, %v28_v3  ;;  %v33_v7 = vadd.f32 %v31_v4, %v29_v5 }
  0x11   :  { %v34_v8 = vmax.f32 %v32_v6, 0.0  ;;  %v35_v9 = vmax.f32 %v33_v7, 0.0 }
  0x13   :  { %36 = vst [vmem:[%s92_s2] sm:$0xff] %v34_v8 }
  0x14   :  { %37 = vst [vmem:[%s92_s2 + $0x8] sm:$0xff] %v35_v9 }
  0x15   :  { %42 = vsyncpa [#allocation3], 1 }

</bundles_post_ra>
